<compile_context>
chip_gen: v6e
topology: v6e:2x2x1
jax: 0.10.0
libtpu: 0.0.40
codegen_flags: <defaults>
</compile_context>

<pallas_src>
import functools

import jax
import jax.numpy as jnp
import numpy as np
from jax import lax
from jax.experimental import pallas as pl
from jax.experimental.pallas import tpu as pltpu


_KRON_MAX_H = 32       # fused-operator path when H <= this
_PATH_B_BF16 = False   # TODO(synk): enable on v5e/v6e when tolerance allows (>1e-2)


def _round_up(x, m):
    return ((x + m - 1) // m) * m


def _vmem_budget():
    """Generation-aware VMEM budget (bytes) with headroom for Mosaic scratch."""
    cap = None
    try:
        info = pltpu.get_tpu_info()
        for name in ("vmem_capacity_bytes", "vmem_bytes", "vmem_size_bytes"):
            v = getattr(info, name, None)
            if v:
                cap = int(v)
                break
    except Exception:
        cap = None
    if not cap or cap <= 0:
        cap = 64 * 1024 * 1024            # conservative: v7x physical VMEM
    return max(32 * 1024 * 1024, (cap // 8) * 7)


def _dft_matrix_np(H):
    """Ortho DFT matrix F[j,k] = exp(-2*pi*i*((j*k) mod H)/H)/sqrt(H), complex128."""
    j = np.arange(H, dtype=np.int64)
    jk = np.outer(j, j) % H                       # mod-first: exact phase
    ang = -2.0 * np.pi * jk.astype(np.float64) / H
    return (np.cos(ang) + 1j * np.sin(ang)) / np.sqrt(H)


def _as_concrete_np(a):
    """Concrete numpy value of `a`, or None if it is a JAX tracer."""
    try:
        return np.asarray(a)
    except Exception:
        return None


# ----------------------------------------------------------------------------
# Path A: small images -> single fused-operator matmul per (batch, col) tile
# ----------------------------------------------------------------------------
_OP_CACHE = {}


@functools.lru_cache(maxsize=4)
def _kron_g_f32(H):
    F = _dft_matrix_np(H)
    G = np.kron(F, F)                              # (H^2, H^2) complex, symmetric
    return G.real.astype(np.float32), G.imag.astype(np.float32)


def _build_op_host(H, mask_np):
    """Host-side float64 fused operator, memoized on (H, binarized mask)."""
    mb = (np.asarray(mask_np, np.float64).reshape(-1) > 0.5).astype(np.float64)
    key = (H, mb.tobytes())
    op = _OP_CACHE.get(key)
    if op is None:
        F = _dft_matrix_np(H)
        G = np.kron(F, F)                          # symmetric
        M = (G * mb[None, :]) @ np.conj(G)         # G . diag(mb) . conj(G)
        op = np.block([[M.real, M.imag],
                       [-M.imag, M.real]]).astype(np.float32)
        if len(_OP_CACHE) >= 4:
            _OP_CACHE.pop(next(iter(_OP_CACHE)))
        _OP_CACHE[key] = op
    return op


def _build_op_traced(H, mask):
    """XLA-side operator build for traced (learned) masks; kron factors cached."""
    # TODO(synk): when the mask is a traced parameter XLA rebuilds this operator
    # every call (~8.6 GFLOP at H=32); hoist/cache it outside the step function
    # whenever the mask is static between steps.
    gr_np, gi_np = _kron_g_f32(H)
    Gr = jnp.asarray(gr_np)
    Gi = jnp.asarray(gi_np)
    mb = (jnp.reshape(jnp.asarray(mask, jnp.float32), (-1,)) > 0.5).astype(jnp.float32)
    Pr = Gr * mb[None, :]
    Pi = Gi * mb[None, :]
    hi = lax.Precision.HIGHEST
    Mr = jnp.matmul(Pr, Gr, precision=hi) + jnp.matmul(Pi, Gi, precision=hi)
    Mi = jnp.matmul(Pi, Gr, precision=hi) - jnp.matmul(Pr, Gi, precision=hi)
    return jnp.concatenate(
        [jnp.concatenate([Mr, Mi], axis=1),
         jnp.concatenate([-Mi, Mr], axis=1)], axis=0)        # (2n, 2n)


def _kron_kernel(x_ref, op_ref, o_ref):
    # one lane-dense (Bt, 2n) @ (2n, ncol) f32 matmul on the MXU
    o_ref[...] = jnp.dot(x_ref[...], op_ref[...],
                         preferred_element_type=jnp.float32)


def _choose_kron_bt(B, n, budget, nsplit):
    ncol = (2 * n) // nsplit
    per_row = 2 * 4 * (2 * n) + 2 * 4 * ncol       # double-buffered in + out rows
    op_bytes = 2 * 4 * (2 * n) * ncol              # double-buffered op column block
    avail = budget - op_bytes - (4 << 20)
    cap = max(8, (avail // per_row) // 8 * 8) if avail > 0 else 8
    if B <= 512:
        bt = _round_up(max(B, 1), 8)
    else:
        cands = (512, 256, 128, 64, 32, 16, 8)     # minimize padding, prefer large
        bt = min(cands, key=lambda t: (_round_up(B, t) - B, -t))
    return int(max(8, min(bt, cap)))


def _mask_layer2d_kron(xr, xi, mask, H, budget):
    B = xr.shape[0]
    n = H * H

    mask_np = _as_concrete_np(mask)
    if mask_np is not None:
        op = jnp.asarray(_build_op_host(H, mask_np))   # cached float64 build
    else:
        op = _build_op_traced(H, mask)

    # fused [real | imag] row-vector slab per image
    xs = jnp.concatenate([xr.reshape(B, n), xi.reshape(B, n)], axis=1)   # (B, 2n)

    # split the 2n output columns into 2 parallel blocks -> >=2 grid steps so
    # v7x megacore can use both TensorCores even at tiny batch sizes; the op
    # half-blocks (double-buffered) cost exactly one full operator of VMEM.
    nsplit = 2 if (n % 128 == 0) else 1
    ncol = (2 * n) // nsplit
    Bt = _choose_kron_bt(B, n, budget, nsplit)
    Bp = _round_up(B, Bt)
    if Bp != B:
        xs = jnp.pad(xs, ((0, Bp - B), (0, 0)))

    flops = 2 * Bp * (2 * n) * (2 * n)
    bytes_accessed = 4 * (2 * Bp * 2 * n + (2 * n) * (2 * n))

    out = pl.pallas_call(
        _kron_kernel,
        out_shape=jax.ShapeDtypeStruct((Bp, 2 * n), jnp.float32),
        grid_spec=pltpu.PrefetchScalarGridSpec(
            num_scalar_prefetch=0,
            # j outermost so the op column block is DMA'd only once per half.
            grid=(nsplit, Bp // Bt),
            in_specs=[pl.BlockSpec((Bt, 2 * n), lambda j, b: (b, 0)),
                      pl.BlockSpec((2 * n, ncol), lambda j, b: (0, j))],
            out_specs=pl.BlockSpec((Bt, ncol), lambda j, b: (b, j))),
        compiler_params=pltpu.CompilerParams(
            dimension_semantics=("parallel", "parallel"),
            vmem_limit_bytes=int(budget)),
        cost_estimate=pl.CostEstimate(flops=int(flops), transcendentals=0,
                                      bytes_accessed=int(bytes_accessed)),
    )(xs, op)

    out = out[:B]
    return out[:, :n].reshape(B, H, H), out[:, n:].reshape(B, H, H)


# ----------------------------------------------------------------------------
# Path B: larger images -> batched block-matmul DFT chain
#   per image (slab [Xr|Xi], F symmetric, G = conj(F)):
#     T  = X F            (right-mult by BF, batched over images)
#     T' = T^T = F X^T    (per-image half-transpose, XLU)
#     U  = T' F = Y^T     (right-mult by BF)
#     K' = mask^T . U     (elementwise)
#     V  = K' G           (right-mult by BG)
#     V' = V^T = G K      (per-image half-transpose)
#     Z  = V' G           (right-mult by BG)  -> IFFT2(mask . FFT2(X))
# ----------------------------------------------------------------------------
@functools.lru_cache(maxsize=8)
def _dft_block_mats_np(H):
    Fc = _dft_matrix_np(H)
    Fr = Fc.real.astype(np.float32)
    Fi = Fc.imag.astype(np.float32)
    BF = np.block([[Fr, Fi], [-Fi, Fr]])     # right-mult by F
    BG = np.block([[Fr, -Fi], [Fi, Fr]])     # right-mult by conj(F)
    return BF, BG


def _fft_mask_kernel(x_ref, mt_ref, bf_ref, bg_ref, o_ref, *, use_bf16=False):
    Bt, H, W = x_ref.shape                 # W == 2*H
    cdt = jnp.bfloat16 if use_bf16 else jnp.float32
    BF = bf_ref[...].astype(cdt)
    BG = bg_ref[...].astype(cdt)
    MT = mt_ref[...]                       # pre-binarized transposed mask, (H, 2H)

    def half_t(a):                         # per-image transpose of both H x H halves
        return jnp.concatenate(
            [jnp.swapaxes(a[:, :, :H], 1, 2),
             jnp.swapaxes(a[:, :, H:], 1, 2)], axis=-1)

    def mm(a, m):                          # one (Bt*H, 2H) @ (2H, 2H) MXU matmul
        return jnp.dot(a.reshape(Bt * H, W).astype(cdt), m,
                       preferred_element_type=jnp.float32).reshape(Bt, H, W)

    t = mm(x_ref[...], BF)                 # X F
    t = half_t(t)                          # (X F)^T = F X^T
    u = mm(t, BF)                          # F X^T F = (FFT2 X)^T
    k = u * MT                             # (mask . FFT2 X)^T
    v = mm(k, BG)                          # K^T conj(F)
    v = half_t(v)                          # conj(F) K
    o_ref[...] = mm(v, BG)                 # conj(F) K conj(F) = IFFT2(K)


def _mask_layer2d_general(xr, xi, mask, H, budget):
    B = xr.shape[0]
    bf_np, bg_np = _dft_block_mats_np(H)
    BF = jnp.asarray(bf_np)
    BG = jnp.asarray(bg_np)
    mb_t = (jnp.reshape(mask, (H, H)) > 0.5).astype(jnp.float32).T
    MT = jnp.concatenate([mb_t, mb_t], axis=1)              # (H, 2H)

    xs = jnp.concatenate([xr, xi], axis=-1)                 # (B, H, 2H) slabs

    # temporaries-aware tile: ~4 double-buffered slabs (in+out) + ~4 live temps.
    # TODO(synk): for H >= ~512 on v7x split the DFT stages into row/column
    # stripes instead of whole-image slabs to bound the working set.
    slab = 4 * H * 2 * H
    const_bytes = 4 * (2 * (2 * H) * (2 * H) + H * 2 * H)
    bt_cap = max(1, int((budget - const_bytes - (4 << 20)) // (8 * slab)))
    Bt = max(1, min(bt_cap, 16, B))
    if B >= 2:
        Bt = min(Bt, (B + 1) // 2)        # >= 2 parallel grid steps for megacore
    Bp = _round_up(B, Bt)
    if Bp != B:
        xs = jnp.pad(xs, ((0, Bp - B), (0, 0), (0, 0)))

    flops = 4 * 2 * Bp * H * (2 * H) * (2 * H)               # 4 block matmuls
    bytes_accessed = 4 * (2 * Bp * H * 2 * H + 2 * (2 * H) * (2 * H) + H * 2 * H)

    kernel = functools.partial(_fft_mask_kernel, use_bf16=_PATH_B_BF16)
    out = pl.pallas_call(
        kernel,
        out_shape=jax.ShapeDtypeStruct((Bp, H, 2 * H), jnp.float32),
        grid_spec=pltpu.PrefetchScalarGridSpec(
            num_scalar_prefetch=0,
            grid=(Bp // Bt,),
            in_specs=[pl.BlockSpec((Bt, H, 2 * H), lambda b: (b, 0, 0)),
                      # constants: single VMEM-resident copy, no pipeline buffers
                      pl.BlockSpec(memory_space=pltpu.MemorySpace.VMEM),
                      pl.BlockSpec(memory_space=pltpu.MemorySpace.VMEM),
                      pl.BlockSpec(memory_space=pltpu.MemorySpace.VMEM)],
            out_specs=pl.BlockSpec((Bt, H, 2 * H), lambda b: (b, 0, 0))),
        compiler_params=pltpu.CompilerParams(
            dimension_semantics=("parallel",),
            vmem_limit_bytes=int(budget)),
        cost_estimate=pl.CostEstimate(flops=int(flops), transcendentals=0,
                                      bytes_accessed=int(bytes_accessed)),
    )(xs, MT, BF, BG)

    out = out[:B]
    return out[:, :, :H], out[:, :, H:]


# ----------------------------------------------------------------------------
# Public wrapper (matches MaskLayer2D.forward)
# ----------------------------------------------------------------------------
def mask_layer2d(x, mask, image_size):
    """Pallas-TPU forward of MaskLayer2D. Returns (B, 1, H, W, 2) float32."""
    H = image_size
    x5 = jnp.asarray(x, jnp.float32).reshape(-1, 1, H, H, 2)
    B = x5.shape[0]
    xr = x5[:, 0, :, :, 0]
    xi = x5[:, 0, :, :, 1]
    budget = _vmem_budget()

    # TODO(synk): for large batches at H == 32 the general path (32*B*H^3 flops)
    # beats the fused operator (8*B*H^4); make this crossover batch-aware.
    if H <= _KRON_MAX_H:
        yr, yi = _mask_layer2d_kron(xr, xi, mask, H, budget)
    else:
        yr, yi = _mask_layer2d_general(xr, xi, jnp.asarray(mask, jnp.float32),
                                       H, budget)

    return jnp.stack([yr, yi], axis=-1).reshape(B, 1, H, H, 2)


def _reference(x, mask, image_size):
    """Pure-JAX reference: IFFT2_ortho((mask>0.5) * FFT2_ortho(x))."""
    H = image_size
    x5 = jnp.asarray(x, jnp.float32).reshape(-1, 1, H, H, 2)
    xc = x5[..., 0] + 1j * x5[..., 1]
    mb = (jnp.reshape(jnp.asarray(mask, jnp.float32), (H, H)) > 0.5).astype(jnp.float32)
    k = jnp.fft.fft2(xc, norm="ortho") * mb
    rec = jnp.fft.ifft2(k, norm="ortho")
    return jnp.stack([jnp.real(rec), jnp.imag(rec)], axis=-1)


if __name__ == "__main__":
    key = jax.random.PRNGKey(0)
    k1, k2, k3, k4 = jax.random.split(key, 4)
    fn = jax.jit(mask_layer2d, static_argnums=2)

    # Tolerance hedges possible MXU f32-emulation differences across TPU
    # generations; Mosaic f32 matmuls are normally ~1e-5 accurate.
    ATOL = RTOL = 2e-2

    # --- Path A (fused operator), H = 16, B = 2, traced mask ---
    H1, B = 16, 2
    x1 = jax.random.normal(k1, (B, 1, H1, H1, 2), dtype=jnp.float32)
    m1 = jax.random.uniform(k2, (H1, H1), dtype=jnp.float32)
    out1 = jax.block_until_ready(fn(x1, m1, H1))
    assert out1.shape == (B, 1, H1, H1, 2)
    ref1 = _reference(x1, m1, H1)
    np.testing.assert_allclose(np.asarray(out1), np.asarray(ref1),
                               atol=ATOL, rtol=RTOL)

    # --- Path A with a concrete (host numpy) mask -> cached float64 operator ---
    out1b = jax.block_until_ready(mask_layer2d(x1, np.asarray(m1), H1))
    np.testing.assert_allclose(np.asarray(out1b), np.asarray(ref1),
                               atol=ATOL, rtol=RTOL)

    # --- Path B (batched block-matmul DFT chain), H = 128, B = 2 ---
    H2 = 128
    x2 = jax.random.normal(k3, (B, 1, H2, H2, 2), dtype=jnp.float32)
    m2 = jax.random.uniform(k4, (H2, H2), dtype=jnp.float32)
    out2 = jax.block_until_ready(fn(x2, m2, H2))
    assert out2.shape == (B, 1, H2, H2, 2)
    ref2 = _reference(x2, m2, H2)
    np.testing.assert_allclose(np.asarray(out2), np.asarray(ref2),
                               atol=ATOL, rtol=RTOL)

    print("KERNEL_OK")
</pallas_src>

<mosaic_0001>
module attributes {stable_mosaic.version = 11 : i64} {
  func.func @_kron_kernel(%arg0: i32, %arg1: i32, %arg2: memref<8x512xf32, #tpu.memory_space<vmem>>, %arg3: memref<512x256xf32, #tpu.memory_space<vmem>>, %arg4: memref<8x256xf32, #tpu.memory_space<vmem>>) attributes {dimension_semantics = [#tpu.dimension_semantics<parallel>, #tpu.dimension_semantics<parallel>], iteration_bounds = array<i64: 2, 1>, scalar_prefetch = 0 : i64, scratch_operands = 0 : i64, tpu.core_type = #tpu.core_type<tc>, window_params = [{transform_indices = @transform_0, window_bounds = array<i64: 8, 512>}, {transform_indices = @transform_1, window_bounds = array<i64: 512, 256>}, {transform_indices = @transform_2, window_bounds = array<i64: 8, 256>}]} {
    %c0 = arith.constant 0 : index
    %c0_0 = arith.constant 0 : index
    %0 = vector.load %arg2[%c0, %c0_0] : memref<8x512xf32, #tpu.memory_space<vmem>>, vector<8x512xf32>
    %c0_1 = arith.constant 0 : index
    %c0_2 = arith.constant 0 : index
    %1 = vector.load %arg3[%c0_1, %c0_2] : memref<512x256xf32, #tpu.memory_space<vmem>>, vector<512x256xf32>
    %cst = arith.constant dense<0.000000e+00> : vector<8x256xf32>
    %2 = tpu.matmul %0, %1, %cst {dimension_numbers = #tpu.dot_dimension_numbers<[1], [0], [0], [1], [0, 0, 1, 1], [], []>} : vector<8x512xf32>, vector<512x256xf32>, vector<8x256xf32> -> vector<8x256xf32>
    %c0_3 = arith.constant 0 : index
    %c0_4 = arith.constant 0 : index
    %3 = vector.load %arg4[%c0_3, %c0_4] : memref<8x256xf32, #tpu.memory_space<vmem>>, vector<8x256xf32>
    tpu.vector_store %arg4[%c0_3, %c0_4], %2 {strides = array<i32>} : memref<8x256xf32, #tpu.memory_space<vmem>>, vector<8x256xf32>,
    return
  }
  func.func @transform_0(%arg0: i32, %arg1: i32) -> (i32, i32) {
    %c0_i32 = arith.constant 0 : i32
    %c0_i32_0 = arith.constant 0 : i32
    return %arg1, %c0_i32 : i32, i32
  }
  func.func @transform_1(%arg0: i32, %arg1: i32) -> (i32, i32) {
    %c0_i32 = arith.constant 0 : i32
    %c0_i32_0 = arith.constant 0 : i32
    return %c0_i32, %arg0 : i32, i32
  }
  func.func @transform_2(%arg0: i32, %arg1: i32) -> (i32, i32) {
    %c0_i32 = arith.constant 0 : i32
    return %arg1, %arg0 : i32, i32
  }
}

</mosaic_0001>

<bundles_post_ra>
// kernel: squeeze.2
= control target key start
LH: loop header
LB: loop body
LE: loop exit
PB: predicated region body
PF: predicated region fallthrough
CT: control target
= control target key end

     0   :  { %s8_s6 = smov 3  ;;  %s11_s7 = smov 12  ;;  %vm13_vm0 = vcmask 1043458   ;;  %vm3_vm1 = vcmask 130048   ;;  %vm17_vm2 = vcmask 1048448   ;;  %vm31_vm3 = vcmask 917248   ;;  %s216_s0 = inlined_call_operand.vmem [shape: f32[2,16,16], index: 0, kind: input, shape index: {}]   ;;  %s217_s1 = inlined_call_operand.vmem [shape: f32[2,256], index: 1, kind: output, shape index: {}]  }
   0x1   :  { %v119_v0 = vld [vmem:[%s216_s0 + $0x7] ss:$16 sm:%s8_s6]   ;;  %v120_v1 = vld [vmem:[%s216_s0 - $0x11] ss:$16 sm:%s11_s7]   ;;  %s36_s12 = smov 3  ;;  %s39_s15 = smov 12 }
   0x2   :  { %v14_v2 = vsel %vm13_vm0, %v120_v1, %v119_v0  ;;  %v123_v3 = vld [vmem:[%s216_s0 + $0x5] ss:$16 sm:%s36_s12]   ;;  %s141_s16 = smov 112   ;;  %v124_v4 = vld [vmem:[%s216_s0 - $0x13] ss:$16 sm:%s39_s15]   ;;  %s22_s19 = smov 3 }
   0x3   :  { %15 = vrot.lane.b32.xlu0 %v14_v2, %s141_s16  ;;  %s25_s20 = smov 12  ;;  %v42_v5 = vsel %vm13_vm0, %v124_v4, %v123_v3  ;;  %v121_v6 = vld [vmem:[%s216_s0 + $0x6] ss:$16 sm:%s22_s19]   ;;  %s50_s25 = smov 3  ;;  %vm45_vm4 = vcmask 786048   ;;  %vm59_vm5 = vcmask 654848  }
   0x4   :  { %v122_v7 = vld [vmem:[%s216_s0 - $0x12] ss:$16 sm:%s25_s20]   ;;  %s142_s26 = smov 80   ;;  %v125_v9 = vld [vmem:[%s216_s0 + $0x4] ss:$16 sm:%s50_s25]   ;;  %s53_s29 = smov 12 }
   0x5   :  { %43 = vrot.lane.b32.xlu1 %v42_v5, %s142_s26  ;;  %v28_v8 = vsel %vm13_vm0, %v122_v7, %v121_v6  ;;  %v126_v10 = vld [vmem:[%s216_s0 - $0x14] ss:$16 sm:%s53_s29]   ;;  %s64_s3 = smov 3  ;;  %s67_s4 = smov 12  ;;  %vm73_vm6 = vcmask 523648   ;;  %vm87_vm7 = vcmask 392448  }
   0x6   :  { %s143_s5 = smov 96   ;;  %v56_v11 = vsel %vm13_vm0, %v126_v10, %v125_v9  ;;  %v127_v12 = vld [vmem:[%s216_s0 + $0x3] ss:$16 sm:%s64_s3]   ;;  %s78_s8 = smov 3  ;;  %v128_v13 = vld [vmem:[%s216_s0 - $0x15] ss:$16 sm:%s67_s4]  }
   0x7   :  { %29 = vrot.lane.b32.xlu0 %v28_v8, %s143_s5  ;;  %v129_v14 = vld [vmem:[%s216_s0 + $0x2] ss:$16 sm:%s78_s8]   ;;  %s81_s13 = smov 12  ;;  %s144_s14 = smov 64   ;;  %v70_v15 = vsel %vm13_vm0, %v128_v13, %v127_v12  ;;  %vm101_vm8 = vcmask 261248  }
   0x8   :  { %v130_v16 = vld [vmem:[%s216_s0 - $0x16] ss:$16 sm:%s81_s13]   ;;  %s92_s17 = smov 3  ;;  %s95_s18 = smov 12 }
   0x9   :  { %57 = vrot.lane.b32.xlu1 %v56_v11, %s144_s14  ;;  %v84_v17 = vsel %vm13_vm0, %v130_v16, %v129_v14  ;;  %v131_v18 = vld [vmem:[%s216_s0 + $0x1] ss:$16 sm:%s92_s17]   ;;  %s145_s23 = smov 48   ;;  %v2_v20 = vld [vmem:[%s216_s0] ss:$8 sm:$0xf]  }
   0xa   :  { %v132_v19 = vld [vmem:[%s216_s0 - $0x17] ss:$16 sm:%s95_s18]   ;;  %4 = vst.msk [vmem:[#allocation0] ss:$8 sm:$0x3] %vm3_vm1, %v2_v20   ;;  %s146_s0 = smov 32  }
   0xb   :  { %71 = vrot.lane.b32.xlu0 %v70_v15, %s145_s23  ;;  %v98_v21 = vsel %vm13_vm0, %v132_v19, %v131_v18  ;;  %6 = vst.msk [vmem:[#allocation0 - $0xf] ss:$8 sm:$0xc] %vm3_vm1, %v2_v20   ;;  %s147_s26 = smov 16  }
   0xd   :  { %85 = vrot.lane.b32.xlu1 %v84_v17, %s146_s0 }
   0xf   :  { %99 = vrot.lane.b32.xlu0 %v98_v21, %s147_s26 }
  0x75   :  { %v16_v22 = vpop.permute.xlu0 %15  }
  0x76   :  { %18 = vst.msk [vmem:[#allocation0] sm:$0x3] %vm17_vm2, %v16_v22   ;;  %20 = vst.msk [vmem:[#allocation0 + $0x6] sm:$0xc] %vm17_vm2, %v16_v22  }
  0x77   :  { %v44_v23 = vpop.permute.xlu1 %43  }
  0x79   :  { %v30_v24 = vpop.permute.xlu0 %29  }
  0x7a   :  { %32 = vst.msk [vmem:[#allocation0] sm:$0x3] %vm31_vm3, %v30_v24   ;;  %34 = vst.msk [vmem:[#allocation0 + $0x6] sm:$0xc] %vm31_vm3, %v30_v24  }
  0x7b   :  { %46 = vst.msk [vmem:[#allocation0] sm:$0x3] %vm45_vm4, %v44_v23   ;;  %48 = vst.msk [vmem:[#allocation0 + $0x6] sm:$0xc] %vm45_vm4, %v44_v23   ;;  %v58_v25 = vpop.permute.xlu1 %57  }
  0x7c   :  { %60 = vst.msk [vmem:[#allocation0] sm:$0x3] %vm59_vm5, %v58_v25   ;;  %62 = vst.msk [vmem:[#allocation0 + $0x6] sm:$0xc] %vm59_vm5, %v58_v25  }
  0x7d   :  { %v72_v26 = vpop.permute.xlu0 %71  }
  0x7e   :  { %74 = vst.msk [vmem:[#allocation0] sm:$0x3] %vm73_vm6, %v72_v26   ;;  %76 = vst.msk [vmem:[#allocation0 + $0x6] sm:$0xc] %vm73_vm6, %v72_v26  }
  0x7f   :  { %v86_v27 = vpop.permute.xlu1 %85  }
  0x80   :  { %88 = vst.msk [vmem:[#allocation0] sm:$0x3] %vm87_vm7, %v86_v27   ;;  %90 = vst.msk [vmem:[#allocation0 + $0x6] sm:$0xc] %vm87_vm7, %v86_v27  }
  0x81   :  { %v100_v28 = vpop.permute.xlu0 %99  }
  0x82   :  { %102 = vst.msk [vmem:[#allocation0] sm:$0x3] %vm101_vm8, %v100_v28   ;;  %104 = vst.msk [vmem:[#allocation0 + $0x6] sm:$0xc] %vm101_vm8, %v100_v28  }
  0x89   :  { %v109_v29 = vld [vmem:[#allocation0] sm:$0x3]  ;;  %v114_v30 = vld [vmem:[#allocation0 + $0x8] sm:$0x3] }
  0x8a   :  { %112 = vst [vmem:[%s217_s1] sm:$0x3] %v109_v29  ;;  %133 = vst [vmem:[%s217_s1 + $0x2] sm:$0x3] %v114_v30 }

// kernel: mask_layer2d.1
= control target key start
LH: loop header
LB: loop body
LE: loop exit
PB: predicated region body
PF: predicated region fallthrough
CT: control target
= control target key end

     0   :  { %s950_s9 = smov 0   ;;  %s952_s10 = smov 0   ;;  %s1417_s0 = inlined_call_operand.vmem [shape: f32[8,512], index: 0, kind: input, shape index: {}]   ;;  %s1418_s1 = inlined_call_operand.vmem [shape: f32[512,512], index: 1, kind: input, shape index: {}]   ;;  %s1419_s2 = inlined_call_operand.vmem [shape: f32[8,512], index: 2, kind: output, shape index: {}]  }
   0x1   :  { %s954_s11 = smov 0   ;;  %s956_s12 = smov 0  }
   0x2   :  { %s958_s13 = smov 0  }
   0x3 LB: > { %s24_s14 = sadd.s32 1, %s929_s12  ;;  %p64_p1 = scmp.ne.s32.totalorder %s921_s10, %s917_s9  ;;  %s933_s13 = sphi %s958_s13, %s12_s13   ;;  %s929_s12 = sphi %s956_s12, %s1423_s12   ;;  %s925_s11 = sphi %s954_s11, %s1422_s11   ;;  %s921_s10 = sphi %s952_s10, %s1421_s10   ;;  %s917_s9 = sphi %s950_s9, %s1420_s9  }
   0x4   : > { %p26_p0 = scmp.ge.s32.totalorder %s24_s14, 2  ;;  %p65_p2 = scmp.eq.s32.totalorder %s933_s13, 0 }
   0x5   : > { %s57_s16 = sadd.s32 1, %s921_s10  ;;  %p844_p5 = scmp.ge.s32.totalorder %s933_s13, 2 }
   0x6   : > { %s1425_s14 = smov (%p26_p0, %s24_s14), 0  ;;  %p66_p3 = por %p65_p2, %p64_p1 }
   0x7   : > { %s54_s15 = ssub.s32 %s929_s12, %s1425_s14  ;;  %126 = sbr.rel (%p844_p5) target bundleno = 80 (0x50), region = 20 }
   0x8   : > { %p55_p4 = scmp.eq.s32.totalorder %s54_s15, 0 }
   0xa   : > { %s985_s17 = scalar_select %p55_p4, %s921_s10, %s57_s16  }
   0xc   : > { %129 = sbr.rel (!%p66_p3) target bundleno = 80 (0x50), region = 24  ;;  %s131_s18 = sand.u32 (%p66_p3), 1, %s921_s10  }
   0xd   : > { %s854_s19 = sshll.u32 (%p66_p3), %s929_s12, 4  ;;  %s845_s20 = sshll.u32 (%p66_p3), %s131_s18, 10 }
   0xe   : > { %s993_s23 = scalar_lea.vmem (%p66_p3), %s1418_s1, %s854_s19  ;;  %s998_s24 = scalar_lea.vmem (%p66_p3), [#allocation2], %s845_s20 }
   0xf   : > { %v149_v0 = vld [vmem:[%s993_s23] sm:$0xff] (%p66_p3)  ;;  %v151_v1 = vld [vmem:[%s993_s23 + $0x8] sm:$0xff] (%p66_p3) }
  0x10   : > { %v153_v2 = vld [vmem:[%s993_s23 + $0x20] sm:$0xff] (%p66_p3)  ;;  %150 = vst [vmem:[%s998_s24] sm:$0xff] (%p66_p3), %v149_v0  ;;  %152 = vst [vmem:[%s998_s24 + $0x8] sm:$0xff] (%p66_p3), %v151_v1  ;;  %v155_v3 = vld [vmem:[%s993_s23 + $0x28] sm:$0xff] (%p66_p3) }
  0x11   : > { %154 = vst [vmem:[%s998_s24 + $0x10] sm:$0xff] %v153_v2  ;;  %v157_v4 = vld [vmem:[%s993_s23 + $0x40] sm:$0xff]  ;;  %v159_v5 = vld [vmem:[%s993_s23 + $0x48] sm:$0xff]  ;;  %156 = vst [vmem:[%s998_s24 + $0x18] sm:$0xff] %v155_v3 }
  0x12   : > { %158 = vst [vmem:[%s998_s24 + $0x20] sm:$0xff] %v157_v4  ;;  %160 = vst [vmem:[%s998_s24 + $0x28] sm:$0xff] %v159_v5  ;;  %v161_v6 = vld [vmem:[%s993_s23 + $0x60] sm:$0xff]  ;;  %v163_v7 = vld [vmem:[%s993_s23 + $0x68] sm:$0xff] }
  0x13   : > { %v165_v8 = vld [vmem:[%s993_s23 + $0x80] sm:$0xff]  ;;  %162 = vst [vmem:[%s998_s24 + $0x30] sm:$0xff] %v161_v6  ;;  %164 = vst [vmem:[%s998_s24 + $0x38] sm:$0xff] %v163_v7  ;;  %v167_v9 = vld [vmem:[%s993_s23 + $0x88] sm:$0xff] }
  0x14   : > { %166 = vst [vmem:[%s998_s24 + $0x40] sm:$0xff] %v165_v8  ;;  %v169_v10 = vld [vmem:[%s993_s23 + $0xa0] sm:$0xff]  ;;  %v171_v11 = vld [vmem:[%s993_s23 + $0xa8] sm:$0xff]  ;;  %168 = vst [vmem:[%s998_s24 + $0x48] sm:$0xff] %v167_v9 }
  0x15   : > { %170 = vst [vmem:[%s998_s24 + $0x50] sm:$0xff] %v169_v10  ;;  %172 = vst [vmem:[%s998_s24 + $0x58] sm:$0xff] %v171_v11  ;;  %v173_v12 = vld [vmem:[%s993_s23 + $0xc0] sm:$0xff]  ;;  %v175_v13 = vld [vmem:[%s993_s23 + $0xc8] sm:$0xff] }
  0x16   : > { %v177_v14 = vld [vmem:[%s993_s23 + $0xe0] sm:$0xff]  ;;  %174 = vst [vmem:[%s998_s24 + $0x60] sm:$0xff] %v173_v12  ;;  %176 = vst [vmem:[%s998_s24 + $0x68] sm:$0xff] %v175_v13  ;;  %v179_v15 = vld [vmem:[%s993_s23 + $0xe8] sm:$0xff] }
  0x17   : > { %178 = vst [vmem:[%s998_s24 + $0x70] sm:$0xff] %v177_v14  ;;  %v181_v16 = vld [vmem:[%s993_s23 + $0x100] sm:$0xff]  ;;  %v183_v17 = vld [vmem:[%s993_s23 + $0x108] sm:$0xff]  ;;  %180 = vst [vmem:[%s998_s24 + $0x78] sm:$0xff] %v179_v15 }
  0x18   : > { %182 = vst [vmem:[%s998_s24 + $0x80] sm:$0xff] %v181_v16  ;;  %184 = vst [vmem:[%s998_s24 + $0x88] sm:$0xff] %v183_v17  ;;  %v185_v18 = vld [vmem:[%s993_s23 + $0x120] sm:$0xff]  ;;  %v187_v19 = vld [vmem:[%s993_s23 + $0x128] sm:$0xff] }
  0x19   : > { %v189_v20 = vld [vmem:[%s993_s23 + $0x140] sm:$0xff]  ;;  %186 = vst [vmem:[%s998_s24 + $0x90] sm:$0xff] %v185_v18  ;;  %188 = vst [vmem:[%s998_s24 + $0x98] sm:$0xff] %v187_v19  ;;  %v191_v21 = vld [vmem:[%s993_s23 + $0x148] sm:$0xff] }
  0x1a   : > { %190 = vst [vmem:[%s998_s24 + $0xa0] sm:$0xff] %v189_v20  ;;  %v193_v22 = vld [vmem:[%s993_s23 + $0x160] sm:$0xff]  ;;  %v195_v23 = vld [vmem:[%s993_s23 + $0x168] sm:$0xff]  ;;  %192 = vst [vmem:[%s998_s24 + $0xa8] sm:$0xff] %v191_v21 }
  0x1b   : > { %194 = vst [vmem:[%s998_s24 + $0xb0] sm:$0xff] %v193_v22  ;;  %196 = vst [vmem:[%s998_s24 + $0xb8] sm:$0xff] %v195_v23  ;;  %v197_v24 = vld [vmem:[%s993_s23 + $0x180] sm:$0xff]  ;;  %v199_v25 = vld [vmem:[%s993_s23 + $0x188] sm:$0xff] }
  0x1c   : > { %v201_v26 = vld [vmem:[%s993_s23 + $0x1a0] sm:$0xff]  ;;  %198 = vst [vmem:[%s998_s24 + $0xc0] sm:$0xff] %v197_v24  ;;  %200 = vst [vmem:[%s998_s24 + $0xc8] sm:$0xff] %v199_v25  ;;  %v203_v27 = vld [vmem:[%s993_s23 + $0x1a8] sm:$0xff] }
  0x1d   : > { %202 = vst [vmem:[%s998_s24 + $0xd0] sm:$0xff] %v201_v26  ;;  %v205_v28 = vld [vmem:[%s993_s23 + $0x1c0] sm:$0xff]  ;;  %v207_v29 = vld [vmem:[%s993_s23 + $0x1c8] sm:$0xff]  ;;  %204 = vst [vmem:[%s998_s24 + $0xd8] sm:$0xff] %v203_v27 }
  0x1e   : > { %206 = vst [vmem:[%s998_s24 + $0xe0] sm:$0xff] %v205_v28  ;;  %208 = vst [vmem:[%s998_s24 + $0xe8] sm:$0xff] %v207_v29  ;;  %v209_v30 = vld [vmem:[%s993_s23 + $0x1e0] sm:$0xff]  ;;  %v211_v31 = vld [vmem:[%s993_s23 + $0x1e8] sm:$0xff] }
  0x1f   : > { %v213_v32 = vld [vmem:[%s993_s23 + $0x200] sm:$0xff]  ;;  %210 = vst [vmem:[%s998_s24 + $0xf0] sm:$0xff] %v209_v30  ;;  %212 = vst [vmem:[%s998_s24 + $0xf8] sm:$0xff] %v211_v31  ;;  %v215_v33 = vld [vmem:[%s993_s23 + $0x208] sm:$0xff] }
  0x20   : > { %214 = vst [vmem:[%s998_s24 + $0x100] sm:$0xff] %v213_v32  ;;  %v217_v34 = vld [vmem:[%s993_s23 + $0x220] sm:$0xff]  ;;  %v219_v35 = vld [vmem:[%s993_s23 + $0x228] sm:$0xff]  ;;  %216 = vst [vmem:[%s998_s24 + $0x108] sm:$0xff] %v215_v33 }
  0x21   : > { %218 = vst [vmem:[%s998_s24 + $0x110] sm:$0xff] %v217_v34  ;;  %220 = vst [vmem:[%s998_s24 + $0x118] sm:$0xff] %v219_v35  ;;  %v221_v36 = vld [vmem:[%s993_s23 + $0x240] sm:$0xff]  ;;  %v223_v37 = vld [vmem:[%s993_s23 + $0x248] sm:$0xff] }
  0x22   : > { %v225_v38 = vld [vmem:[%s993_s23 + $0x260] sm:$0xff]  ;;  %222 = vst [vmem:[%s998_s24 + $0x120] sm:$0xff] %v221_v36  ;;  %224 = vst [vmem:[%s998_s24 + $0x128] sm:$0xff] %v223_v37  ;;  %v227_v39 = vld [vmem:[%s993_s23 + $0x268] sm:$0xff] }
  0x23   : > { %226 = vst [vmem:[%s998_s24 + $0x130] sm:$0xff] %v225_v38  ;;  %v229_v40 = vld [vmem:[%s993_s23 + $0x280] sm:$0xff]  ;;  %v231_v41 = vld [vmem:[%s993_s23 + $0x288] sm:$0xff]  ;;  %228 = vst [vmem:[%s998_s24 + $0x138] sm:$0xff] %v227_v39 }
  0x24   : > { %230 = vst [vmem:[%s998_s24 + $0x140] sm:$0xff] %v229_v40  ;;  %232 = vst [vmem:[%s998_s24 + $0x148] sm:$0xff] %v231_v41  ;;  %v233_v42 = vld [vmem:[%s993_s23 + $0x2a0] sm:$0xff]  ;;  %v235_v43 = vld [vmem:[%s993_s23 + $0x2a8] sm:$0xff] }
  0x25   : > { %v237_v44 = vld [vmem:[%s993_s23 + $0x2c0] sm:$0xff]  ;;  %234 = vst [vmem:[%s998_s24 + $0x150] sm:$0xff] %v233_v42  ;;  %236 = vst [vmem:[%s998_s24 + $0x158] sm:$0xff] %v235_v43  ;;  %v239_v45 = vld [vmem:[%s993_s23 + $0x2c8] sm:$0xff] }
  0x26   : > { %238 = vst [vmem:[%s998_s24 + $0x160] sm:$0xff] %v237_v44  ;;  %v241_v46 = vld [vmem:[%s993_s23 + $0x2e0] sm:$0xff]  ;;  %v243_v47 = vld [vmem:[%s993_s23 + $0x2e8] sm:$0xff]  ;;  %240 = vst [vmem:[%s998_s24 + $0x168] sm:$0xff] %v239_v45 }
  0x27   : > { %242 = vst [vmem:[%s998_s24 + $0x170] sm:$0xff] %v241_v46  ;;  %244 = vst [vmem:[%s998_s24 + $0x178] sm:$0xff] %v243_v47  ;;  %v245_v48 = vld [vmem:[%s993_s23 + $0x300] sm:$0xff]  ;;  %v247_v49 = vld [vmem:[%s993_s23 + $0x308] sm:$0xff] }
  0x28   : > { %v249_v50 = vld [vmem:[%s993_s23 + $0x320] sm:$0xff]  ;;  %246 = vst [vmem:[%s998_s24 + $0x180] sm:$0xff] %v245_v48  ;;  %248 = vst [vmem:[%s998_s24 + $0x188] sm:$0xff] %v247_v49  ;;  %v251_v51 = vld [vmem:[%s993_s23 + $0x328] sm:$0xff] }
  0x29   : > { %250 = vst [vmem:[%s998_s24 + $0x190] sm:$0xff] %v249_v50  ;;  %v253_v52 = vld [vmem:[%s993_s23 + $0x340] sm:$0xff]  ;;  %v255_v53 = vld [vmem:[%s993_s23 + $0x348] sm:$0xff]  ;;  %252 = vst [vmem:[%s998_s24 + $0x198] sm:$0xff] %v251_v51 }
  0x2a   : > { %254 = vst [vmem:[%s998_s24 + $0x1a0] sm:$0xff] %v253_v52  ;;  %256 = vst [vmem:[%s998_s24 + $0x1a8] sm:$0xff] %v255_v53  ;;  %v257_v54 = vld [vmem:[%s993_s23 + $0x360] sm:$0xff]  ;;  %v259_v55 = vld [vmem:[%s993_s23 + $0x368] sm:$0xff] }
  0x2b   : > { %v261_v56 = vld [vmem:[%s993_s23 + $0x380] sm:$0xff]  ;;  %258 = vst [vmem:[%s998_s24 + $0x1b0] sm:$0xff] %v257_v54  ;;  %260 = vst [vmem:[%s998_s24 + $0x1b8] sm:$0xff] %v259_v55  ;;  %v263_v57 = vld [vmem:[%s993_s23 + $0x388] sm:$0xff] }
  0x2c   : > { %262 = vst [vmem:[%s998_s24 + $0x1c0] sm:$0xff] %v261_v56  ;;  %v265_v58 = vld [vmem:[%s993_s23 + $0x3a0] sm:$0xff]  ;;  %v267_v59 = vld [vmem:[%s993_s23 + $0x3a8] sm:$0xff]  ;;  %264 = vst [vmem:[%s998_s24 + $0x1c8] sm:$0xff] %v263_v57 }
  0x2d   : > { %266 = vst [vmem:[%s998_s24 + $0x1d0] sm:$0xff] %v265_v58  ;;  %268 = vst [vmem:[%s998_s24 + $0x1d8] sm:$0xff] %v267_v59  ;;  %v269_v60 = vld [vmem:[%s993_s23 + $0x3c0] sm:$0xff]  ;;  %v271_v61 = vld [vmem:[%s993_s23 + $0x3c8] sm:$0xff] }
  0x2e   : > { %v273_v62 = vld [vmem:[%s993_s23 + $0x3e0] sm:$0xff]  ;;  %270 = vst [vmem:[%s998_s24 + $0x1e0] sm:$0xff] %v269_v60  ;;  %272 = vst [vmem:[%s998_s24 + $0x1e8] sm:$0xff] %v271_v61  ;;  %v275_v63 = vld [vmem:[%s993_s23 + $0x3e8] sm:$0xff] }
  0x2f   : > { %274 = vst [vmem:[%s998_s24 + $0x1f0] sm:$0xff] %v273_v62  ;;  %v277_v0 = vld [vmem:[%s993_s23 + $0x400] sm:$0xff]  ;;  %v279_v1 = vld [vmem:[%s993_s23 + $0x408] sm:$0xff]  ;;  %276 = vst [vmem:[%s998_s24 + $0x1f8] sm:$0xff] %v275_v63 }
  0x30   : > { %278 = vst [vmem:[%s998_s24 + $0x200] sm:$0xff] %v277_v0  ;;  %280 = vst [vmem:[%s998_s24 + $0x208] sm:$0xff] %v279_v1  ;;  %v281_v2 = vld [vmem:[%s993_s23 + $0x420] sm:$0xff]  ;;  %v283_v3 = vld [vmem:[%s993_s23 + $0x428] sm:$0xff] }
  0x31   : > { %v285_v4 = vld [vmem:[%s993_s23 + $0x440] sm:$0xff]  ;;  %282 = vst [vmem:[%s998_s24 + $0x210] sm:$0xff] %v281_v2  ;;  %284 = vst [vmem:[%s998_s24 + $0x218] sm:$0xff] %v283_v3  ;;  %v287_v5 = vld [vmem:[%s993_s23 + $0x448] sm:$0xff] }
  0x32   : > { %286 = vst [vmem:[%s998_s24 + $0x220] sm:$0xff] %v285_v4  ;;  %v289_v6 = vld [vmem:[%s993_s23 + $0x460] sm:$0xff]  ;;  %v291_v7 = vld [vmem:[%s993_s23 + $0x468] sm:$0xff]  ;;  %288 = vst [vmem:[%s998_s24 + $0x228] sm:$0xff] %v287_v5 }
  0x33   : > { %290 = vst [vmem:[%s998_s24 + $0x230] sm:$0xff] %v289_v6  ;;  %292 = vst [vmem:[%s998_s24 + $0x238] sm:$0xff] %v291_v7  ;;  %v293_v8 = vld [vmem:[%s993_s23 + $0x480] sm:$0xff]  ;;  %v295_v9 = vld [vmem:[%s993_s23 + $0x488] sm:$0xff] }
  0x34   : > { %v297_v10 = vld [vmem:[%s993_s23 + $0x4a0] sm:$0xff]  ;;  %294 = vst [vmem:[%s998_s24 + $0x240] sm:$0xff] %v293_v8  ;;  %296 = vst [vmem:[%s998_s24 + $0x248] sm:$0xff] %v295_v9  ;;  %v299_v11 = vld [vmem:[%s993_s23 + $0x4a8] sm:$0xff] }
  0x35   : > { %298 = vst [vmem:[%s998_s24 + $0x250] sm:$0xff] %v297_v10  ;;  %v301_v12 = vld [vmem:[%s993_s23 + $0x4c0] sm:$0xff]  ;;  %v303_v13 = vld [vmem:[%s993_s23 + $0x4c8] sm:$0xff]  ;;  %300 = vst [vmem:[%s998_s24 + $0x258] sm:$0xff] %v299_v11 }
  0x36   : > { %302 = vst [vmem:[%s998_s24 + $0x260] sm:$0xff] %v301_v12  ;;  %304 = vst [vmem:[%s998_s24 + $0x268] sm:$0xff] %v303_v13  ;;  %v305_v14 = vld [vmem:[%s993_s23 + $0x4e0] sm:$0xff]  ;;  %v307_v15 = vld [vmem:[%s993_s23 + $0x4e8] sm:$0xff] }
  0x37   : > { %v309_v16 = vld [vmem:[%s993_s23 + $0x500] sm:$0xff]  ;;  %306 = vst [vmem:[%s998_s24 + $0x270] sm:$0xff] %v305_v14  ;;  %308 = vst [vmem:[%s998_s24 + $0x278] sm:$0xff] %v307_v15  ;;  %v311_v17 = vld [vmem:[%s993_s23 + $0x508] sm:$0xff] }
  0x38   : > { %310 = vst [vmem:[%s998_s24 + $0x280] sm:$0xff] %v309_v16  ;;  %v313_v18 = vld [vmem:[%s993_s23 + $0x520] sm:$0xff]  ;;  %v315_v19 = vld [vmem:[%s993_s23 + $0x528] sm:$0xff]  ;;  %312 = vst [vmem:[%s998_s24 + $0x288] sm:$0xff] %v311_v17 }
  0x39   : > { %314 = vst [vmem:[%s998_s24 + $0x290] sm:$0xff] %v313_v18  ;;  %316 = vst [vmem:[%s998_s24 + $0x298] sm:$0xff] %v315_v19  ;;  %v317_v20 = vld [vmem:[%s993_s23 + $0x540] sm:$0xff]  ;;  %v319_v21 = vld [vmem:[%s993_s23 + $0x548] sm:$0xff] }
  0x3a   : > { %v321_v22 = vld [vmem:[%s993_s23 + $0x560] sm:$0xff]  ;;  %318 = vst [vmem:[%s998_s24 + $0x2a0] sm:$0xff] %v317_v20  ;;  %320 = vst [vmem:[%s998_s24 + $0x2a8] sm:$0xff] %v319_v21  ;;  %v323_v23 = vld [vmem:[%s993_s23 + $0x568] sm:$0xff] }
  0x3b   : > { %322 = vst [vmem:[%s998_s24 + $0x2b0] sm:$0xff] %v321_v22  ;;  %v325_v24 = vld [vmem:[%s993_s23 + $0x580] sm:$0xff]  ;;  %v327_v25 = vld [vmem:[%s993_s23 + $0x588] sm:$0xff]  ;;  %324 = vst [vmem:[%s998_s24 + $0x2b8] sm:$0xff] %v323_v23 }
  0x3c   : > { %326 = vst [vmem:[%s998_s24 + $0x2c0] sm:$0xff] %v325_v24  ;;  %328 = vst [vmem:[%s998_s24 + $0x2c8] sm:$0xff] %v327_v25  ;;  %v329_v26 = vld [vmem:[%s993_s23 + $0x5a0] sm:$0xff]  ;;  %v331_v27 = vld [vmem:[%s993_s23 + $0x5a8] sm:$0xff] }
  0x3d   : > { %v333_v28 = vld [vmem:[%s993_s23 + $0x5c0] sm:$0xff]  ;;  %330 = vst [vmem:[%s998_s24 + $0x2d0] sm:$0xff] %v329_v26  ;;  %332 = vst [vmem:[%s998_s24 + $0x2d8] sm:$0xff] %v331_v27  ;;  %v335_v29 = vld [vmem:[%s993_s23 + $0x5c8] sm:$0xff] }
  0x3e   : > { %334 = vst [vmem:[%s998_s24 + $0x2e0] sm:$0xff] %v333_v28  ;;  %v337_v30 = vld [vmem:[%s993_s23 + $0x5e0] sm:$0xff]  ;;  %v339_v31 = vld [vmem:[%s993_s23 + $0x5e8] sm:$0xff]  ;;  %336 = vst [vmem:[%s998_s24 + $0x2e8] sm:$0xff] %v335_v29 }
  0x3f   : > { %338 = vst [vmem:[%s998_s24 + $0x2f0] sm:$0xff] %v337_v30  ;;  %340 = vst [vmem:[%s998_s24 + $0x2f8] sm:$0xff] %v339_v31  ;;  %v341_v32 = vld [vmem:[%s993_s23 + $0x600] sm:$0xff]  ;;  %v343_v33 = vld [vmem:[%s993_s23 + $0x608] sm:$0xff] }
  0x40   : > { %v345_v34 = vld [vmem:[%s993_s23 + $0x620] sm:$0xff]  ;;  %342 = vst [vmem:[%s998_s24 + $0x300] sm:$0xff] %v341_v32  ;;  %344 = vst [vmem:[%s998_s24 + $0x308] sm:$0xff] %v343_v33  ;;  %v347_v35 = vld [vmem:[%s993_s23 + $0x628] sm:$0xff] }
  0x41   : > { %346 = vst [vmem:[%s998_s24 + $0x310] sm:$0xff] %v345_v34  ;;  %v349_v36 = vld [vmem:[%s993_s23 + $0x640] sm:$0xff]  ;;  %v351_v37 = vld [vmem:[%s993_s23 + $0x648] sm:$0xff]  ;;  %348 = vst [vmem:[%s998_s24 + $0x318] sm:$0xff] %v347_v35 }
  0x42   : > { %350 = vst [vmem:[%s998_s24 + $0x320] sm:$0xff] %v349_v36  ;;  %352 = vst [vmem:[%s998_s24 + $0x328] sm:$0xff] %v351_v37  ;;  %v353_v38 = vld [vmem:[%s993_s23 + $0x660] sm:$0xff]  ;;  %v355_v39 = vld [vmem:[%s993_s23 + $0x668] sm:$0xff] }
  0x43   : > { %v357_v40 = vld [vmem:[%s993_s23 + $0x680] sm:$0xff]  ;;  %354 = vst [vmem:[%s998_s24 + $0x330] sm:$0xff] %v353_v38  ;;  %356 = vst [vmem:[%s998_s24 + $0x338] sm:$0xff] %v355_v39  ;;  %v359_v41 = vld [vmem:[%s993_s23 + $0x688] sm:$0xff] }
  0x44   : > { %358 = vst [vmem:[%s998_s24 + $0x340] sm:$0xff] %v357_v40  ;;  %v361_v42 = vld [vmem:[%s993_s23 + $0x6a0] sm:$0xff]  ;;  %v363_v43 = vld [vmem:[%s993_s23 + $0x6a8] sm:$0xff]  ;;  %360 = vst [vmem:[%s998_s24 + $0x348] sm:$0xff] %v359_v41 }
  0x45   : > { %362 = vst [vmem:[%s998_s24 + $0x350] sm:$0xff] %v361_v42  ;;  %364 = vst [vmem:[%s998_s24 + $0x358] sm:$0xff] %v363_v43  ;;  %v365_v44 = vld [vmem:[%s993_s23 + $0x6c0] sm:$0xff]  ;;  %v367_v45 = vld [vmem:[%s993_s23 + $0x6c8] sm:$0xff] }
  0x46   : > { %v369_v46 = vld [vmem:[%s993_s23 + $0x6e0] sm:$0xff]  ;;  %366 = vst [vmem:[%s998_s24 + $0x360] sm:$0xff] %v365_v44  ;;  %368 = vst [vmem:[%s998_s24 + $0x368] sm:$0xff] %v367_v45  ;;  %v371_v47 = vld [vmem:[%s993_s23 + $0x6e8] sm:$0xff] }
  0x47   : > { %370 = vst [vmem:[%s998_s24 + $0x370] sm:$0xff] %v369_v46  ;;  %v373_v48 = vld [vmem:[%s993_s23 + $0x700] sm:$0xff]  ;;  %v375_v49 = vld [vmem:[%s993_s23 + $0x708] sm:$0xff]  ;;  %372 = vst [vmem:[%s998_s24 + $0x378] sm:$0xff] %v371_v47 }
  0x48   : > { %374 = vst [vmem:[%s998_s24 + $0x380] sm:$0xff] %v373_v48  ;;  %376 = vst [vmem:[%s998_s24 + $0x388] sm:$0xff] %v375_v49  ;;  %v377_v50 = vld [vmem:[%s993_s23 + $0x720] sm:$0xff]  ;;  %v379_v51 = vld [vmem:[%s993_s23 + $0x728] sm:$0xff] }
  0x49   : > { %v381_v52 = vld [vmem:[%s993_s23 + $0x740] sm:$0xff]  ;;  %378 = vst [vmem:[%s998_s24 + $0x390] sm:$0xff] %v377_v50  ;;  %380 = vst [vmem:[%s998_s24 + $0x398] sm:$0xff] %v379_v51  ;;  %v383_v53 = vld [vmem:[%s993_s23 + $0x748] sm:$0xff] }
  0x4a   : > { %382 = vst [vmem:[%s998_s24 + $0x3a0] sm:$0xff] %v381_v52  ;;  %v385_v54 = vld [vmem:[%s993_s23 + $0x760] sm:$0xff]  ;;  %v387_v55 = vld [vmem:[%s993_s23 + $0x768] sm:$0xff]  ;;  %384 = vst [vmem:[%s998_s24 + $0x3a8] sm:$0xff] %v383_v53 }
  0x4b   : > { %386 = vst [vmem:[%s998_s24 + $0x3b0] sm:$0xff] %v385_v54  ;;  %388 = vst [vmem:[%s998_s24 + $0x3b8] sm:$0xff] %v387_v55  ;;  %v389_v56 = vld [vmem:[%s993_s23 + $0x780] sm:$0xff]  ;;  %v391_v57 = vld [vmem:[%s993_s23 + $0x788] sm:$0xff] }
  0x4c   : > { %v393_v58 = vld [vmem:[%s993_s23 + $0x7a0] sm:$0xff]  ;;  %390 = vst [vmem:[%s998_s24 + $0x3c0] sm:$0xff] %v389_v56  ;;  %392 = vst [vmem:[%s998_s24 + $0x3c8] sm:$0xff] %v391_v57  ;;  %v395_v59 = vld [vmem:[%s993_s23 + $0x7a8] sm:$0xff] }
  0x4d   : > { %394 = vst [vmem:[%s998_s24 + $0x3d0] sm:$0xff] %v393_v58  ;;  %v397_v60 = vld [vmem:[%s993_s23 + $0x7c0] sm:$0xff]  ;;  %v399_v61 = vld [vmem:[%s993_s23 + $0x7c8] sm:$0xff]  ;;  %396 = vst [vmem:[%s998_s24 + $0x3d8] sm:$0xff] %v395_v59 }
  0x4e   : > { %398 = vst [vmem:[%s998_s24 + $0x3e0] sm:$0xff] %v397_v60  ;;  %400 = vst [vmem:[%s998_s24 + $0x3e8] sm:$0xff] %v399_v61  ;;  %v401_v62 = vld [vmem:[%s993_s23 + $0x7e0] sm:$0xff]  ;;  %v403_v63 = vld [vmem:[%s993_s23 + $0x7e8] sm:$0xff] }
  0x4f   : > { %402 = vst [vmem:[%s998_s24 + $0x3f0] sm:$0xff] %v401_v62  ;;  %404 = vst [vmem:[%s998_s24 + $0x3f8] sm:$0xff] %v403_v63 }
  0x50 PF: > { %p848_p6 = scmp.ge.s32.totalorder %s933_s13, 1  ;;  %p409_p7 = scmp.lt.s32.totalorder %s933_s13, 3 }
  0x52   : > { %p410_p8 = pnand %p848_p6, %p409_p7 }
  0x53   : > { %s416_s25 = sand.u32 (!%p410_p8), 1, %s917_s9   ;;  %s850_s8 = sshll.u32 (!%p410_p8), %s925_s11, 1 }
  0x54   : > { %413 = sbr.rel (%p410_p8) target bundleno = 354 (0x162), region = 47  ;;  %s849_s30 = sshll.u32 (!%p410_p8), %s416_s25, 10 }
  0x55   : > { %s1262_s3 = scalar_lea.vmem (!%p410_p8), [#allocation2], %s849_s30  ;;  %p455_p9 = scmp.lt.s32.totalorder (!%p410_p8), %s850_s8, 3 }
  0x59   : > { %v463_v0 = vld [vmem:[%s1417_s0 + $0x8] sm:$0xff]  ;;  %v465_v1 = vld [vmem:[%s1417_s0 + $0x18] sm:$0xff]  ;;  %v496_v4 = vld [vmem:[%s1262_s3 + $0xf0] sm:$0xff]  ;;  %s1427_s8 = smov (!%p455_p9, %s850_s8), 3 }
  0x5a   : > { %658 = vmatprep.mubr.f32.mxu0 %v463_v0  ;;  %729 = vmatprep.mubr.f32.mxu1 %v465_v1  ;;  %v497_v2 = vld [vmem:[%s1262_s3 + $0xf8] sm:$0xff]  ;;  %v560_v5 = vld [vmem:[%s1262_s3 + $0x2f0] sm:$0xff]  ;;  %v495_v6 = vld [vmem:[%s1262_s3 + $0xe8] sm:$0xff]  ;;  %s851_s9 = sshll.u32 %s1427_s8, 3 }
  0x5b   : > { %v561_v3 = vld [vmem:[%s1262_s3 + $0x2f8] sm:$0xff]  ;;  %594 = vmatprep.subr.mxu0 %v497_v2  ;;  %v559_v7 = vld [vmem:[%s1262_s3 + $0x2e8] sm:$0xff]  ;;  %v494_v8 = vld [vmem:[%s1262_s3 + $0xe0] sm:$0xff]  ;;  %s460_s18 = scalar_lea.vmem %s1419_s2, %s851_s9 }
  0x5c   : > { %665 = vmatprep.subr.mxu1 %v561_v3  ;;  %595 = vmatpush1.msra.mxu0 %v496_v4  ;;  %v558_v9 = vld [vmem:[%s1262_s3 + $0x2e0] sm:$0xff]  ;;  %v493_v10 = vld [vmem:[%s1262_s3 + $0xd8] sm:$0xff]  ;;  %v492_v12 = vld [vmem:[%s1262_s3 + $0xd0] sm:$0xff] }
  0x5d   : > { %666 = vmatpush1.msra.mxu1 %v560_v5  ;;  %596 = vmatprep.subr.mxu0 %v495_v6  ;;  %v557_v11 = vld [vmem:[%s1262_s3 + $0x2d8] sm:$0xff]  ;;  %v556_v13 = vld [vmem:[%s1262_s3 + $0x2d0] sm:$0xff]  ;;  %v491_v14 = vld [vmem:[%s1262_s3 + $0xc8] sm:$0xff] }
  0x5e   : > { %667 = vmatprep.subr.mxu1 %v559_v7  ;;  %597 = vmatpush1.msra.mxu0 %v494_v8  ;;  %v555_v15 = vld [vmem:[%s1262_s3 + $0x2c8] sm:$0xff]  ;;  %v490_v16 = vld [vmem:[%s1262_s3 + $0xc0] sm:$0xff]  ;;  %v489_v18 = vld [vmem:[%s1262_s3 + $0xb8] sm:$0xff] }
  0x5f   : > { %668 = vmatpush1.msra.mxu1 %v558_v9  ;;  %598 = vmatprep.subr.mxu0 %v493_v10  ;;  %v554_v17 = vld [vmem:[%s1262_s3 + $0x2c0] sm:$0xff]  ;;  %v553_v19 = vld [vmem:[%s1262_s3 + $0x2b8] sm:$0xff]  ;;  %v488_v20 = vld [vmem:[%s1262_s3 + $0xb0] sm:$0xff] }
  0x60   : > { %669 = vmatprep.subr.mxu1 %v557_v11  ;;  %599 = vmatpush1.msra.mxu0 %v492_v12  ;;  %v552_v21 = vld [vmem:[%s1262_s3 + $0x2b0] sm:$0xff]  ;;  %v487_v22 = vld [vmem:[%s1262_s3 + $0xa8] sm:$0xff]  ;;  %v486_v24 = vld [vmem:[%s1262_s3 + $0xa0] sm:$0xff] }
  0x61   : > { %670 = vmatpush1.msra.mxu1 %v556_v13  ;;  %600 = vmatprep.subr.mxu0 %v491_v14  ;;  %v551_v23 = vld [vmem:[%s1262_s3 + $0x2a8] sm:$0xff]  ;;  %v550_v25 = vld [vmem:[%s1262_s3 + $0x2a0] sm:$0xff]  ;;  %v485_v26 = vld [vmem:[%s1262_s3 + $0x98] sm:$0xff] }
  0x62   : > { %671 = vmatprep.subr.mxu1 %v555_v15  ;;  %601 = vmatpush1.msra.mxu0 %v490_v16  ;;  %v549_v27 = vld [vmem:[%s1262_s3 + $0x298] sm:$0xff]  ;;  %v484_v28 = vld [vmem:[%s1262_s3 + $0x90] sm:$0xff]  ;;  %v483_v30 = vld [vmem:[%s1262_s3 + $0x88] sm:$0xff] }
  0x63   : > { %672 = vmatpush1.msra.mxu1 %v554_v17  ;;  %602 = vmatprep.subr.mxu0 %v489_v18  ;;  %v548_v29 = vld [vmem:[%s1262_s3 + $0x290] sm:$0xff]  ;;  %v547_v31 = vld [vmem:[%s1262_s3 + $0x288] sm:$0xff]  ;;  %v482_v32 = vld [vmem:[%s1262_s3 + $0x80] sm:$0xff] }
  0x64   : > { %673 = vmatprep.subr.mxu1 %v553_v19  ;;  %603 = vmatpush1.msra.mxu0 %v488_v20  ;;  %v546_v33 = vld [vmem:[%s1262_s3 + $0x280] sm:$0xff]  ;;  %v481_v34 = vld [vmem:[%s1262_s3 + $0x78] sm:$0xff]  ;;  %v480_v36 = vld [vmem:[%s1262_s3 + $0x70] sm:$0xff] }
  0x65   : > { %674 = vmatpush1.msra.mxu1 %v552_v21  ;;  %604 = vmatprep.subr.mxu0 %v487_v22  ;;  %v545_v35 = vld [vmem:[%s1262_s3 + $0x278] sm:$0xff]  ;;  %v544_v37 = vld [vmem:[%s1262_s3 + $0x270] sm:$0xff]  ;;  %v479_v38 = vld [vmem:[%s1262_s3 + $0x68] sm:$0xff] }
  0x66   : > { %675 = vmatprep.subr.mxu1 %v551_v23  ;;  %605 = vmatpush1.msra.mxu0 %v486_v24  ;;  %v543_v39 = vld [vmem:[%s1262_s3 + $0x268] sm:$0xff]  ;;  %v478_v40 = vld [vmem:[%s1262_s3 + $0x60] sm:$0xff]  ;;  %v477_v42 = vld [vmem:[%s1262_s3 + $0x58] sm:$0xff] }
  0x67   : > { %676 = vmatpush1.msra.mxu1 %v550_v25  ;;  %606 = vmatprep.subr.mxu0 %v485_v26  ;;  %v542_v41 = vld [vmem:[%s1262_s3 + $0x260] sm:$0xff]  ;;  %v541_v43 = vld [vmem:[%s1262_s3 + $0x258] sm:$0xff]  ;;  %v476_v44 = vld [vmem:[%s1262_s3 + $0x50] sm:$0xff] }
  0x68   : > { %677 = vmatprep.subr.mxu1 %v549_v27  ;;  %607 = vmatpush1.msra.mxu0 %v484_v28  ;;  %v540_v45 = vld [vmem:[%s1262_s3 + $0x250] sm:$0xff]  ;;  %v475_v46 = vld [vmem:[%s1262_s3 + $0x48] sm:$0xff]  ;;  %v474_v48 = vld [vmem:[%s1262_s3 + $0x40] sm:$0xff] }
  0x69   : > { %678 = vmatpush1.msra.mxu1 %v548_v29  ;;  %608 = vmatprep.subr.mxu0 %v483_v30  ;;  %v539_v47 = vld [vmem:[%s1262_s3 + $0x248] sm:$0xff]  ;;  %v538_v49 = vld [vmem:[%s1262_s3 + $0x240] sm:$0xff]  ;;  %v473_v50 = vld [vmem:[%s1262_s3 + $0x38] sm:$0xff] }
  0x6a   : > { %679 = vmatprep.subr.mxu1 %v547_v31  ;;  %609 = vmatpush1.msra.mxu0 %v482_v32  ;;  %v537_v51 = vld [vmem:[%s1262_s3 + $0x238] sm:$0xff]  ;;  %v472_v52 = vld [vmem:[%s1262_s3 + $0x30] sm:$0xff]  ;;  %v471_v54 = vld [vmem:[%s1262_s3 + $0x28] sm:$0xff] }
  0x6b   : > { %680 = vmatpush1.msra.mxu1 %v546_v33  ;;  %610 = vmatprep.subr.mxu0 %v481_v34  ;;  %v536_v53 = vld [vmem:[%s1262_s3 + $0x230] sm:$0xff]  ;;  %v535_v55 = vld [vmem:[%s1262_s3 + $0x228] sm:$0xff]  ;;  %v470_v56 = vld [vmem:[%s1262_s3 + $0x20] sm:$0xff] }
  0x6c   : > { %681 = vmatprep.subr.mxu1 %v545_v35  ;;  %611 = vmatpush1.msra.mxu0 %v480_v36  ;;  %v534_v57 = vld [vmem:[%s1262_s3 + $0x220] sm:$0xff]  ;;  %v469_v58 = vld [vmem:[%s1262_s3 + $0x18] sm:$0xff]  ;;  %v468_v60 = vld [vmem:[%s1262_s3 + $0x10] sm:$0xff] }
  0x6d   : > { %682 = vmatpush1.msra.mxu1 %v544_v37  ;;  %612 = vmatprep.subr.mxu0 %v479_v38  ;;  %v533_v59 = vld [vmem:[%s1262_s3 + $0x218] sm:$0xff]  ;;  %v532_v61 = vld [vmem:[%s1262_s3 + $0x210] sm:$0xff]  ;;  %v467_v62 = vld [vmem:[%s1262_s3 + $0x8] sm:$0xff] }
  0x6e   : > { %683 = vmatprep.subr.mxu1 %v543_v39  ;;  %613 = vmatpush1.msra.mxu0 %v478_v40  ;;  %v531_v63 = vld [vmem:[%s1262_s3 + $0x208] sm:$0xff]  ;;  %v466_v0 = vld [vmem:[%s1262_s3] sm:$0xff]  ;;  %v529_v2 = vld [vmem:[%s1262_s3 + $0x1f8] sm:$0xff] }
  0x6f   : > { %684 = vmatpush1.msra.mxu1 %v542_v41  ;;  %614 = vmatprep.subr.mxu0 %v477_v42  ;;  %v530_v1 = vld [vmem:[%s1262_s3 + $0x200] sm:$0xff]  ;;  %v593_v3 = vld [vmem:[%s1262_s3 + $0x3f8] sm:$0xff]  ;;  %v528_v4 = vld [vmem:[%s1262_s3 + $0x1f0] sm:$0xff] }
  0x70   : > { %685 = vmatprep.subr.mxu1 %v541_v43  ;;  %615 = vmatpush1.msra.mxu0 %v476_v44  ;;  %v592_v5 = vld [vmem:[%s1262_s3 + $0x3f0] sm:$0xff]  ;;  %v527_v6 = vld [vmem:[%s1262_s3 + $0x1e8] sm:$0xff]  ;;  %v526_v8 = vld [vmem:[%s1262_s3 + $0x1e0] sm:$0xff] }
  0x71   : > { %686 = vmatpush1.msra.mxu1 %v540_v45  ;;  %616 = vmatprep.subr.mxu0 %v475_v46  ;;  %v591_v7 = vld [vmem:[%s1262_s3 + $0x3e8] sm:$0xff]  ;;  %v590_v9 = vld [vmem:[%s1262_s3 + $0x3e0] sm:$0xff]  ;;  %v525_v10 = vld [vmem:[%s1262_s3 + $0x1d8] sm:$0xff] }
  0x72   : > { %687 = vmatprep.subr.mxu1 %v539_v47  ;;  %617 = vmatpush1.msra.mxu0 %v474_v48  ;;  %v589_v11 = vld [vmem:[%s1262_s3 + $0x3d8] sm:$0xff]  ;;  %v524_v12 = vld [vmem:[%s1262_s3 + $0x1d0] sm:$0xff]  ;;  %v523_v14 = vld [vmem:[%s1262_s3 + $0x1c8] sm:$0xff] }
  0x73   : > { %688 = vmatpush1.msra.mxu1 %v538_v49  ;;  %618 = vmatprep.subr.mxu0 %v473_v50  ;;  %v588_v13 = vld [vmem:[%s1262_s3 + $0x3d0] sm:$0xff]  ;;  %v587_v15 = vld [vmem:[%s1262_s3 + $0x3c8] sm:$0xff]  ;;  %v522_v16 = vld [vmem:[%s1262_s3 + $0x1c0] sm:$0xff] }
  0x74   : > { %689 = vmatprep.subr.mxu1 %v537_v51  ;;  %619 = vmatpush1.msra.mxu0 %v472_v52  ;;  %v586_v17 = vld [vmem:[%s1262_s3 + $0x3c0] sm:$0xff]  ;;  %v521_v18 = vld [vmem:[%s1262_s3 + $0x1b8] sm:$0xff]  ;;  %v520_v20 = vld [vmem:[%s1262_s3 + $0x1b0] sm:$0xff] }
  0x75   : > { %690 = vmatpush1.msra.mxu1 %v536_v53  ;;  %620 = vmatprep.subr.mxu0 %v471_v54  ;;  %v585_v19 = vld [vmem:[%s1262_s3 + $0x3b8] sm:$0xff]  ;;  %v584_v21 = vld [vmem:[%s1262_s3 + $0x3b0] sm:$0xff]  ;;  %v519_v22 = vld [vmem:[%s1262_s3 + $0x1a8] sm:$0xff] }
  0x76   : > { %691 = vmatprep.subr.mxu1 %v535_v55  ;;  %621 = vmatpush1.msra.mxu0 %v470_v56  ;;  %v583_v23 = vld [vmem:[%s1262_s3 + $0x3a8] sm:$0xff]  ;;  %v518_v24 = vld [vmem:[%s1262_s3 + $0x1a0] sm:$0xff]  ;;  %v517_v26 = vld [vmem:[%s1262_s3 + $0x198] sm:$0xff] }
  0x77   : > { %692 = vmatpush1.msra.mxu1 %v534_v57  ;;  %622 = vmatprep.subr.mxu0 %v469_v58  ;;  %v582_v25 = vld [vmem:[%s1262_s3 + $0x3a0] sm:$0xff]  ;;  %v581_v27 = vld [vmem:[%s1262_s3 + $0x398] sm:$0xff]  ;;  %v516_v28 = vld [vmem:[%s1262_s3 + $0x190] sm:$0xff] }
  0x78   : > { %693 = vmatprep.subr.mxu1 %v533_v59  ;;  %623 = vmatpush1.msra.mxu0 %v468_v60  ;;  %v580_v29 = vld [vmem:[%s1262_s3 + $0x390] sm:$0xff]  ;;  %v515_v30 = vld [vmem:[%s1262_s3 + $0x188] sm:$0xff]  ;;  %v514_v32 = vld [vmem:[%s1262_s3 + $0x180] sm:$0xff] }
  0x79   : > { %694 = vmatpush1.msra.mxu1 %v532_v61  ;;  %624 = vmatprep.subr.mxu0 %v467_v62  ;;  %v579_v31 = vld [vmem:[%s1262_s3 + $0x388] sm:$0xff]  ;;  %v578_v33 = vld [vmem:[%s1262_s3 + $0x380] sm:$0xff]  ;;  %v513_v34 = vld [vmem:[%s1262_s3 + $0x178] sm:$0xff] }
  0x7a   : > { %695 = vmatprep.subr.mxu1 %v531_v63  ;;  %625 = vmatpush1.msra.mxu0 %v466_v0  ;;  %v577_v35 = vld [vmem:[%s1262_s3 + $0x378] sm:$0xff]  ;;  %v512_v36 = vld [vmem:[%s1262_s3 + $0x170] sm:$0xff]  ;;  %v511_v38 = vld [vmem:[%s1262_s3 + $0x168] sm:$0xff] }
  0x7b   : > { %696 = vmatpush1.msra.mxu1 %v530_v1  ;;  %626 = vmatprep.subr.mxu0 %v529_v2  ;;  %v576_v37 = vld [vmem:[%s1262_s3 + $0x370] sm:$0xff]  ;;  %v575_v39 = vld [vmem:[%s1262_s3 + $0x368] sm:$0xff]  ;;  %v510_v40 = vld [vmem:[%s1262_s3 + $0x160] sm:$0xff] }
  0x7c   : > { %697 = vmatprep.subr.mxu1 %v593_v3  ;;  %627 = vmatpush2.msra.mxu0 %v528_v4  ;;  %v574_v41 = vld [vmem:[%s1262_s3 + $0x360] sm:$0xff]  ;;  %v509_v42 = vld [vmem:[%s1262_s3 + $0x158] sm:$0xff]  ;;  %v508_v44 = vld [vmem:[%s1262_s3 + $0x150] sm:$0xff] }
  0x7d   : > { %698 = vmatpush2.msra.mxu1 %v592_v5  ;;  %628 = vmatprep.subr.mxu0 %v527_v6  ;;  %v573_v43 = vld [vmem:[%s1262_s3 + $0x358] sm:$0xff]  ;;  %v572_v45 = vld [vmem:[%s1262_s3 + $0x350] sm:$0xff]  ;;  %v507_v46 = vld [vmem:[%s1262_s3 + $0x148] sm:$0xff] }
  0x7e   : > { %699 = vmatprep.subr.mxu1 %v591_v7  ;;  %629 = vmatpush2.msra.mxu0 %v526_v8  ;;  %v571_v47 = vld [vmem:[%s1262_s3 + $0x348] sm:$0xff]  ;;  %v506_v48 = vld [vmem:[%s1262_s3 + $0x140] sm:$0xff]  ;;  %v505_v50 = vld [vmem:[%s1262_s3 + $0x138] sm:$0xff] }
  0x7f   : > { %700 = vmatpush2.msra.mxu1 %v590_v9  ;;  %630 = vmatprep.subr.mxu0 %v525_v10  ;;  %v570_v49 = vld [vmem:[%s1262_s3 + $0x340] sm:$0xff]  ;;  %v569_v51 = vld [vmem:[%s1262_s3 + $0x338] sm:$0xff]  ;;  %v504_v52 = vld [vmem:[%s1262_s3 + $0x130] sm:$0xff] }
  0x80   : > { %701 = vmatprep.subr.mxu1 %v589_v11  ;;  %631 = vmatpush2.msra.mxu0 %v524_v12  ;;  %v568_v53 = vld [vmem:[%s1262_s3 + $0x330] sm:$0xff]  ;;  %v503_v54 = vld [vmem:[%s1262_s3 + $0x128] sm:$0xff]  ;;  %v502_v56 = vld [vmem:[%s1262_s3 + $0x120] sm:$0xff] }
  0x81   : > { %702 = vmatpush2.msra.mxu1 %v588_v13  ;;  %632 = vmatprep.subr.mxu0 %v523_v14  ;;  %v567_v55 = vld [vmem:[%s1262_s3 + $0x328] sm:$0xff]  ;;  %v566_v57 = vld [vmem:[%s1262_s3 + $0x320] sm:$0xff]  ;;  %v501_v58 = vld [vmem:[%s1262_s3 + $0x118] sm:$0xff] }
  0x82   : > { %703 = vmatprep.subr.mxu1 %v587_v15  ;;  %633 = vmatpush2.msra.mxu0 %v522_v16  ;;  %v565_v59 = vld [vmem:[%s1262_s3 + $0x318] sm:$0xff]  ;;  %v500_v60 = vld [vmem:[%s1262_s3 + $0x110] sm:$0xff]  ;;  %v499_v62 = vld [vmem:[%s1262_s3 + $0x108] sm:$0xff] }
  0x83   : > { %704 = vmatpush2.msra.mxu1 %v586_v17  ;;  %634 = vmatprep.subr.mxu0 %v521_v18  ;;  %v564_v61 = vld [vmem:[%s1262_s3 + $0x310] sm:$0xff]  ;;  %v563_v63 = vld [vmem:[%s1262_s3 + $0x308] sm:$0xff]  ;;  %v498_v0 = vld [vmem:[%s1262_s3 + $0x100] sm:$0xff] }
  0x84   : > { %705 = vmatprep.subr.mxu1 %v585_v19  ;;  %635 = vmatpush2.msra.mxu0 %v520_v20  ;;  %v562_v1 = vld [vmem:[%s1262_s3 + $0x300] sm:$0xff]  ;;  %v464_v3 = vld [vmem:[%s1417_s0 + $0x10] sm:$0xff] }
  0x85   : > { %706 = vmatpush2.msra.mxu1 %v584_v21  ;;  %636 = vmatprep.subr.mxu0 %v519_v22  ;;  %v462_v2 = vld [vmem:[%s1417_s0] sm:$0xff] }
  0x86   : > { %707 = vmatprep.subr.mxu1 %v583_v23  ;;  %637 = vmatpush2.msra.mxu0 %v518_v24 }
  0x87   : > { %708 = vmatpush2.msra.mxu1 %v582_v25  ;;  %638 = vmatprep.subr.mxu0 %v517_v26 }
  0x88   : > { %709 = vmatprep.subr.mxu1 %v581_v27  ;;  %639 = vmatpush2.msra.mxu0 %v516_v28 }
  0x89   : > { %710 = vmatpush2.msra.mxu1 %v580_v29  ;;  %640 = vmatprep.subr.mxu0 %v515_v30 }
  0x8a   : > { %711 = vmatprep.subr.mxu1 %v579_v31  ;;  %641 = vmatpush2.msra.mxu0 %v514_v32 }
  0x8b   : > { %712 = vmatpush2.msra.mxu1 %v578_v33  ;;  %642 = vmatprep.subr.mxu0 %v513_v34 }
  0x8c   : > { %713 = vmatprep.subr.mxu1 %v577_v35  ;;  %643 = vmatpush2.msra.mxu0 %v512_v36 }
  0x8d   : > { %714 = vmatpush2.msra.mxu1 %v576_v37  ;;  %644 = vmatprep.subr.mxu0 %v511_v38 }
  0x8e   : > { %715 = vmatprep.subr.mxu1 %v575_v39  ;;  %645 = vmatpush2.msra.mxu0 %v510_v40 }
  0x8f   : > { %716 = vmatpush2.msra.mxu1 %v574_v41  ;;  %646 = vmatprep.subr.mxu0 %v509_v42 }
  0x90   : > { %717 = vmatprep.subr.mxu1 %v573_v43  ;;  %647 = vmatpush2.msra.mxu0 %v508_v44 }
  0x91   : > { %718 = vmatpush2.msra.mxu1 %v572_v45  ;;  %648 = vmatprep.subr.mxu0 %v507_v46 }
  0x92   : > { %719 = vmatprep.subr.mxu1 %v571_v47  ;;  %649 = vmatpush2.msra.mxu0 %v506_v48 }
  0x93   : > { %720 = vmatpush2.msra.mxu1 %v570_v49  ;;  %650 = vmatprep.subr.mxu0 %v505_v50 }
  0x94   : > { %721 = vmatprep.subr.mxu1 %v569_v51  ;;  %651 = vmatpush2.msra.mxu0 %v504_v52 }
  0x95   : > { %722 = vmatpush2.msra.mxu1 %v568_v53  ;;  %652 = vmatprep.subr.mxu0 %v503_v54 }
  0x96   : > { %723 = vmatprep.subr.mxu1 %v567_v55  ;;  %653 = vmatpush2.msra.mxu0 %v502_v56 }
  0x97   : > { %724 = vmatpush2.msra.mxu1 %v566_v57  ;;  %654 = vmatprep.subr.mxu0 %v501_v58 }
  0x98   : > { %725 = vmatprep.subr.mxu1 %v565_v59  ;;  %655 = vmatpush2.msra.mxu0 %v500_v60 }
  0x99   : > { %726 = vmatpush2.msra.mxu1 %v564_v61  ;;  %656 = vmatprep.subr.mxu0 %v499_v62 }
  0x9a   : > { %727 = vmatprep.subr.mxu1 %v563_v63  ;;  %657 = vmatpush2.msra.mxu0 %v498_v0 }
  0x9b   : > { %728 = vmatpush2.msra.mxu1 %v562_v1  ;;  %659 = vmatmul.mubr.f32.vlgmr.msra.gmra.mxu0 %v462_v2 }
  0x9c   : > { %730 = vmatmul.mubr.f32.vlgmr.msra.gmra.mxu1 %v464_v3 }
 0x15b   : > { %v660_v4 = vpop.f32.mrf.mxu0 }
 0x15c   : > { %v731_v5 = vpop.f32.mrf.mxu1 }
 0x15d   : > { %v732_v6 = vadd.f32 %v731_v5, %v660_v4  ;;  %v662_v7 = vpop.f32.mrf.mxu0 }
 0x15e   : > { %v733_v8 = vpop.f32.mrf.mxu1 }
 0x15f   : > { %736 = vst [vmem:[%s460_s18] sm:$0xff] %v732_v6  ;;  %v734_v9 = vadd.f32 %v733_v8, %v662_v7 }
 0x161   : > { %737 = vst [vmem:[%s460_s18 + $0x8] sm:$0xff] %v734_v9 }
 0x162 PF: > { %s12_s13 = sadd.s32 1, %s933_s13   ;;  %s1420_s9 = smov %s921_s10 }
 0x163   : > { %p9_p10 = scmp.ge.s32.totalorder %s12_s13, 4   ;;  %s1421_s10 = smov %s985_s17 }
 0x164   : > { %s1422_s11 = smov %s929_s12  ;;  %s1423_s12 = smov %s1425_s14 }
 0x165   :  { %11 = sbr.rel (!%p9_p10) target bundleno = 3 (0x3), region = 89 }

</bundles_post_ra>
